<compile_context>
chip_gen: v5e
topology: v5e:2x2
jax: 0.10.0
libtpu: 0.0.40
codegen_flags: <defaults>
</compile_context>

<pallas_src>
import functools
import math

import jax
import jax.numpy as jnp
from jax.experimental import pallas as pl
from jax.experimental.pallas import tpu as pltpu


def _vmem_capacity_bytes():
    """Physical VMEM per TensorCore; conservative (v7x) default if query fails."""
    try:
        return int(pltpu.get_tpu_info().vmem_capacity_bytes)
    except Exception:
        return 64 << 20


def _concat_copy_kernel(sizes, axis, *refs):
    """Copy each input block into its static slice of the output block.

    All refs are 2-D.  `axis` selects whether the concat offsets live on the
    sublane axis (0) or the lane axis (1).  Offsets are static Python ints,
    so every store is a static-slice VMEM write (unmasked `vst` whenever the
    offsets are lane-aligned, i.e. the lane-fold path with trailing % 128 == 0).
    """
    *in_refs, out_ref = refs
    off = 0
    for r, n in zip(in_refs, sizes):
        if axis == 0:
            out_ref[off:off + n, :] = r[...]
        else:
            out_ref[:, off:off + n] = r[...]
        off += n


def concat_pallas(xs, dim=1, *, min_bytes=1 << 20):
    """Pallas equivalent of torch.concat(xs, dim=dim) for a static list `xs`."""
    xs = list(xs)
    if not xs:
        raise ValueError("concat_pallas needs at least one input")
    ndim = xs[0].ndim
    if dim < 0:
        dim += ndim
    if not (0 <= dim < ndim):
        raise ValueError(f"dim {dim} out of range for rank {ndim}")

    # --- validation + dtype promotion (torch.concat-like semantics) -------
    base_shape = list(xs[0].shape)
    for x in xs:
        if x.ndim != ndim:
            raise ValueError("all inputs must have the same rank")
        for ax in range(ndim):
            if ax != dim and x.shape[ax] != base_shape[ax]:
                raise ValueError(
                    f"non-concat dim {ax} mismatch: {x.shape} vs {tuple(base_shape)}")
    out_dtype = jnp.result_type(*[x.dtype for x in xs])
    xs = [x.astype(out_dtype) for x in xs]

    c_total = sum(int(x.shape[dim]) for x in xs)
    out_shape_nd = list(base_shape)
    out_shape_nd[dim] = c_total
    out_shape_nd = tuple(out_shape_nd)

    # Zero-size inputs along the concat dim contribute nothing.
    xs = [x for x in xs if x.shape[dim] != 0]
    if not xs:
        return jnp.zeros(out_shape_nd, out_dtype)
    if len(xs) == 1:
        return xs[0]

    itemsize = jnp.dtype(out_dtype).itemsize
    if int(math.prod(out_shape_nd)) * itemsize < min_bytes:
        # pallas_call launch + grid overhead dominates tiny copies.
        return jnp.concatenate(xs, axis=dim)

    chan_sizes = tuple(int(x.shape[dim]) for x in xs)
    leading = int(math.prod(base_shape[:dim]))
    trailing = int(math.prod(base_shape[dim + 1:]))

    # --- per-generation VMEM budget ----------------------------------------
    vmem_cap = _vmem_capacity_bytes()
    budget = min(24 << 20, vmem_cap // 4)        # double-buffered in+out footprint
    sub = max(8, 32 // itemsize)                 # native sublane tile: 8/16/32

    # --- layout selection ----------------------------------------------------
    lane_fold = (trailing < 128) or (trailing % 128 == 0)
    if lane_fold and trailing >= 128:
        # If even the minimum row tile blows the budget, tile the (128-divisible)
        # trailing dim instead of folding it onto the lane axis.
        if 4 * c_total * trailing * min(leading, sub) * itemsize > budget:
            lane_fold = False

    if lane_fold:
        # ---- Case A: fold concat axis (+trailing) onto the 128-lane axis ----
        lane_sizes = tuple(c * trailing for c in chan_sizes)
        lane_total = c_total * trailing
        call_inputs = [x.reshape(leading, n) for x, n in zip(xs, lane_sizes)]

        bytes_per_row = 4 * lane_total * itemsize       # dbl-buffered in + out
        max_rows = max(1, budget // max(1, bytes_per_row))
        if max_rows >= leading:
            tile_l = leading
            if leading >= 2 * sub:
                # Expose >= 2 grid steps: DMA pipelining + v7x megacore.
                tile_l = max(sub, ((leading // 2) // sub) * sub)
        else:
            tile_l = min(leading, max(sub, (max_rows // sub) * sub))

        grid = (pl.cdiv(leading, tile_l),)
        in_specs = [pl.BlockSpec((tile_l, n), lambda l: (l, 0)) for n in lane_sizes]
        out_spec = pl.BlockSpec((tile_l, lane_total), lambda l: (l, 0))
        out_shape2 = (leading, lane_total)
        kernel = functools.partial(_concat_copy_kernel, lane_sizes, 1)
        dim_sem = ("parallel",)
        footprint = bytes_per_row * tile_l
    else:
        # ---- Case B: (leading, C, trailing) with cdiv-tiled trailing --------
        call_inputs = [x.reshape(leading, c, trailing) for x, c in zip(xs, chan_sizes)]

        t_pad = pl.cdiv(trailing, 128) * 128
        max_t = max(1, budget // max(1, 4 * c_total * itemsize))
        tile_t = max(128, (min(max_t, t_pad) // 128) * 128)

        grid = (leading, pl.cdiv(trailing, tile_t))
        in_specs = [
            pl.BlockSpec((pl.Squeezed(), c, tile_t), lambda l, t: (l, 0, t))
            for c in chan_sizes
        ]
        out_spec = pl.BlockSpec((pl.Squeezed(), c_total, tile_t),
                                lambda l, t: (l, 0, t))
        out_shape2 = (leading, c_total, trailing)
        kernel = functools.partial(_concat_copy_kernel, chan_sizes, 0)
        dim_sem = ("parallel", "parallel")
        footprint = 4 * c_total * tile_t * itemsize

    # Smallest scoped-VMEM default is 16 MiB (v5e); request explicitly when the
    # footprint gets close, but never more than half of physical VMEM (v7x: 64 MiB).
    vmem_limit = None
    if footprint > (12 << 20):
        vmem_limit = int(min(footprint + (4 << 20), vmem_cap // 2))

    out2 = pl.pallas_call(
        kernel,
        out_shape=jax.ShapeDtypeStruct(out_shape2, out_dtype),
        grid=grid,
        in_specs=in_specs,
        out_specs=out_spec,
        compiler_params=pltpu.CompilerParams(
            dimension_semantics=dim_sem,
            vmem_limit_bytes=vmem_limit,
        ),
    )(*call_inputs)

    return out2.reshape(out_shape_nd)


if __name__ == "__main__":
    key = jax.random.PRNGKey(0)
    ks = jax.random.split(key, 8)

    # --- Case A (lane fold): NCHW, dim=1, trailing = 16*16 = 256 -------------
    x0 = jax.random.normal(ks[0], (2, 4, 16, 16), dtype=jnp.float32)
    x1 = jax.random.normal(ks[1], (2, 6, 16, 16), dtype=jnp.float32)
    x2 = jax.random.normal(ks[2], (2, 2, 16, 16), dtype=jnp.float32)
    xs = (x0, x1, x2)
    out = jax.block_until_ready(concat_pallas(xs, dim=1, min_bytes=0))
    ref = jnp.concatenate(xs, axis=1)
    assert out.shape == (2, 12, 16, 16), out.shape
    assert out.dtype == ref.dtype, (out.dtype, ref.dtype)
    assert jnp.array_equal(out, ref), "NCHW dim=1 mismatch"

    # --- Case A (last-dim concat, trailing == 1) + dtype promotion -----------
    y0 = jax.random.normal(ks[3], (2, 8, 33), dtype=jnp.float32)
    y1 = jax.random.normal(ks[4], (2, 8, 31), dtype=jnp.bfloat16)
    out = jax.block_until_ready(concat_pallas((y0, y1), dim=-1, min_bytes=0))
    ref = jnp.concatenate((y0, y1), axis=-1)
    assert out.shape == ref.shape and out.dtype == ref.dtype
    assert jnp.array_equal(out, ref), "last-dim concat mismatch"

    # --- Case B (trailing = 200, not 128-divisible) + a zero-size input ------
    z0 = jax.random.normal(ks[5], (2, 3, 5, 40), dtype=jnp.float32)
    z1 = jax.random.normal(ks[6], (2, 5, 5, 40), dtype=jnp.float32)
    z2 = jnp.zeros((2, 0, 5, 40), dtype=jnp.float32)
    out = jax.block_until_ready(concat_pallas((z0, z2, z1), dim=1, min_bytes=0))
    ref = jnp.concatenate((z0, z2, z1), axis=1)
    assert out.shape == ref.shape and jnp.array_equal(out, ref), "case B mismatch"

    # --- default small-problem short-circuit path -----------------------------
    out = jax.block_until_ready(concat_pallas(xs, dim=1))
    assert jnp.array_equal(out, jnp.concatenate(xs, axis=1))

    print("KERNEL_OK")
</pallas_src>

<mosaic_0001>
module attributes {stable_mosaic.version = 11 : i64} {
  func.func @_concat_copy_kernel(%arg0: i32, %arg1: memref<2x1024xf32, #tpu.memory_space<vmem>>, %arg2: memref<2x1536xf32, #tpu.memory_space<vmem>>, %arg3: memref<2x512xf32, #tpu.memory_space<vmem>>, %arg4: memref<2x3072xf32, #tpu.memory_space<vmem>>) attributes {dimension_semantics = [#tpu.dimension_semantics<parallel>], iteration_bounds = array<i64: 1>, scalar_prefetch = 0 : i64, scratch_operands = 0 : i64, tpu.core_type = #tpu.core_type<tc>, window_params = [{transform_indices = @transform_0, window_bounds = array<i64: 2, 1024>}, {transform_indices = @transform_1, window_bounds = array<i64: 2, 1536>}, {transform_indices = @transform_2, window_bounds = array<i64: 2, 512>}, {transform_indices = @transform_3, window_bounds = array<i64: 2, 3072>}]} {
    %c0 = arith.constant 0 : index
    %c0_0 = arith.constant 0 : index
    %0 = vector.load %arg1[%c0, %c0_0] : memref<2x1024xf32, #tpu.memory_space<vmem>>, vector<2x1024xf32>
    %c0_1 = arith.constant 0 : index
    %c0_2 = arith.constant 0 : index
    %1 = vector.load %arg4[%c0_1, %c0_2] : memref<2x3072xf32, #tpu.memory_space<vmem>>, vector<2x1024xf32>
    tpu.vector_store %arg4[%c0_1, %c0_2], %0 {strides = array<i32>} : memref<2x3072xf32, #tpu.memory_space<vmem>>, vector<2x1024xf32>,
    %c0_3 = arith.constant 0 : index
    %c0_4 = arith.constant 0 : index
    %2 = vector.load %arg2[%c0_3, %c0_4] : memref<2x1536xf32, #tpu.memory_space<vmem>>, vector<2x1536xf32>
    %c0_5 = arith.constant 0 : index
    %c1024 = arith.constant 1024 : index
    %3 = vector.load %arg4[%c0_5, %c1024] : memref<2x3072xf32, #tpu.memory_space<vmem>>, vector<2x1536xf32>
    tpu.vector_store %arg4[%c0_5, %c1024], %2 {strides = array<i32>} : memref<2x3072xf32, #tpu.memory_space<vmem>>, vector<2x1536xf32>,
    %c0_6 = arith.constant 0 : index
    %c0_7 = arith.constant 0 : index
    %4 = vector.load %arg3[%c0_6, %c0_7] : memref<2x512xf32, #tpu.memory_space<vmem>>, vector<2x512xf32>
    %c0_8 = arith.constant 0 : index
    %c2560 = arith.constant 2560 : index
    %5 = vector.load %arg4[%c0_8, %c2560] : memref<2x3072xf32, #tpu.memory_space<vmem>>, vector<2x512xf32>
    tpu.vector_store %arg4[%c0_8, %c2560], %4 {strides = array<i32>} : memref<2x3072xf32, #tpu.memory_space<vmem>>, vector<2x512xf32>,
    return
  }
  func.func @transform_0(%arg0: i32) -> (i32, i32) {
    %c0_i32 = arith.constant 0 : i32
    %c0_i32_0 = arith.constant 0 : i32
    return %arg0, %c0_i32 : i32, i32
  }
  func.func @transform_1(%arg0: i32) -> (i32, i32) {
    %c0_i32 = arith.constant 0 : i32
    %c0_i32_0 = arith.constant 0 : i32
    return %arg0, %c0_i32 : i32, i32
  }
  func.func @transform_2(%arg0: i32) -> (i32, i32) {
    %c0_i32 = arith.constant 0 : i32
    %c0_i32_0 = arith.constant 0 : i32
    return %arg0, %c0_i32 : i32, i32
  }
  func.func @transform_3(%arg0: i32) -> (i32, i32) {
    %c0_i32 = arith.constant 0 : i32
    %c0_i32_0 = arith.constant 0 : i32
    return %arg0, %c0_i32 : i32, i32
  }
}

</mosaic_0001>

<bundles_post_ra>
// kernel: tpu_custom_call.1
= control target key start
LH: loop header
LB: loop body
LE: loop exit
PB: predicated region body
PF: predicated region fallthrough
CT: control target
= control target key end

     0   :  { %8 = vsyncpa [#allocation3], 0  ;;  %s228_s0 = inlined_call_operand.hbm [shape: f32[2,1024], index: 0, kind: input, shape index: {}]   ;;  %s229_s1 = inlined_call_operand.hbm [shape: f32[2,1536], index: 1, kind: input, shape index: {}]   ;;  %s230_s2 = inlined_call_operand.hbm [shape: f32[2,512], index: 2, kind: input, shape index: {}]   ;;  %s231_s3 = inlined_call_operand.hbm [shape: f32[2,3072], index: 3, kind: output, shape index: {}]  }
   0x1   :  { %9 = vsyncpa [#allocation6], 0  ;;  %s27_s14 = sshll.u32 %s229_s1, 4  ;;  %s28_s14 = int_to_ptr.hbm [resolvable:$true] %s27_s14 }
   0x2   :  { %10 = vsyncpa [#allocation4], 0  ;;  %s192_s15 = smov [#allocation5]   ;;  %s16_s19 = sshll.u32 %s228_s0, 4  ;;  %s17_s19 = int_to_ptr.hbm [resolvable:$true] %s16_s19 }
   0x3   :  { %s29_s16 = sshll.u32 %s192_s15, 4  ;;  %s193_s20 = smov [#allocation2]   ;;  %s30_s16 = int_to_ptr.vmem [resolvable:$true] %s29_s16 }
   0x4   :  { %32 = dma.hbm_to_vmem [thread:$0]  %s28_s14, 384, %s30_s16, [#allocation6]  }
   0x5   :  { %s18_s21 = sshll.u32 %s193_s20, 4  ;;  %s38_s24 = sshll.u32 %s230_s2, 4  ;;  %s19_s21 = int_to_ptr.vmem [resolvable:$true] %s18_s21  ;;  %s39_s24 = int_to_ptr.hbm [resolvable:$true] %s38_s24 }
   0x6   :  { %21 = dma.hbm_to_vmem [thread:$0]  %s17_s19, 256, %s19_s21, [#allocation3]  }
   0x7   :  { %s194_s1 = smov [#allocation7]  }
   0x8   :  { %s40_s25 = sshll.u32 %s194_s1, 4  ;;  %s41_s25 = int_to_ptr.vmem [resolvable:$true] %s40_s25 }
   0x9   :  { %43 = dma.hbm_to_vmem [thread:$0]  %s39_s24, 128, %s41_s25, [#allocation6]  }
   0xa   :  { %186 = dma.done.wait [#allocation3], 256  }
   0xb   :  { %187 = vsyncadd [#allocation3], 4294967040 }
   0xc   :  { %188 = dma.done.wait [#allocation6], 512  }
   0xd   :  { %189 = vsyncadd [#allocation6], 4294966784  ;;  %v56_v0 = vld [vmem:[#allocation2] sm:$0xff]  ;;  %v57_v1 = vld [vmem:[#allocation2 + $0x8] sm:$0xff]  ;;  %s195_s0 = smov [#allocation8]   ;;  %s75_s28 = sshll.u32 %s231_s3, 4  ;;  %s76_s28 = int_to_ptr.hbm [resolvable:$true] %s75_s28 }
   0xe   :  { %v60_v2 = vld [vmem:[#allocation5] sm:$0xff]  ;;  %58 = vst [vmem:[#allocation8] sm:$0xff] %v56_v0  ;;  %v61_v3 = vld [vmem:[#allocation5 + $0x8] sm:$0xff]  ;;  %s73_s26 = sshll.u32 %s195_s0, 4  ;;  %v62_v4 = vld [vmem:[#allocation5 + $0x10] sm:$0xff]  ;;  %s74_s26 = int_to_ptr.vmem [resolvable:$true] %s73_s26 }
   0xf   :  { %59 = vst [vmem:[#allocation8 + $0x8] sm:$0xff] %v57_v1  ;;  %v66_v5 = vld [vmem:[#allocation7] sm:$0xff] }
  0x10   :  { %63 = vst [vmem:[#allocation8 + $0x10] sm:$0xff] %v60_v2 }
  0x11   :  { %64 = vst [vmem:[#allocation8 + $0x18] sm:$0xff] %v61_v3 }
  0x12   :  { %65 = vst [vmem:[#allocation8 + $0x20] sm:$0xff] %v62_v4 }
  0x13   :  { %67 = vst [vmem:[#allocation8 + $0x28] sm:$0xff] %v66_v5 }
  0x14   :  { %78 = dma.vmem_to_hbm [thread:$0]  %s74_s26, 768, %s76_s28, [#allocation4]  }
  0x15   :  { %190 = dma.done.wait [#allocation4], 768  }
  0x16   :  { %191 = vsyncadd [#allocation4], 4294966528 }
  0x17   :  { %83 = vsyncpa [#allocation3], 1 }
  0x18   :  { %84 = vsyncpa [#allocation6], 1 }
  0x19   :  { %85 = vsyncpa [#allocation4], 1 }

</bundles_post_ra>
